<compile_context>
chip_gen: v7x
topology: tpu7x:2x2x1
jax: 0.10.0
libtpu: 0.0.40
codegen_flags: <defaults>
</compile_context>

<pallas_src>
import jax
import jax.numpy as jnp
import numpy as np
from jax.experimental import pallas as pl
from jax.experimental.pallas import tpu as pltpu


_BINOMIAL = {
    1: [1.0],
    2: [1.0, 1.0],
    3: [1.0, 2.0, 1.0],
    4: [1.0, 3.0, 3.0, 1.0],
    5: [1.0, 4.0, 6.0, 4.0, 1.0],
    6: [1.0, 5.0, 10.0, 10.0, 5.0, 1.0],
    7: [1.0, 6.0, 15.0, 20.0, 15.0, 6.0, 1.0],
}

_VMEM_BUDGET = 28 << 20  # bytes, for all double-buffered input/output blocks (K excluded)


def _spatial_weight(H, W, filt_size, stride, pad_lo, pad_hi):
    """(H*W, H_out*W_out) matrix with normalized binomial blur, stride and the
    replicate padding of H and W all folded in."""
    a = np.asarray(_BINOMIAL[filt_size], dtype=np.float64)
    a = a / a.sum()  # outer(a, a) == normalized 2D filter (sums to 1)
    Hp, Wp = H + pad_lo + pad_hi, W + pad_lo + pad_hi
    H_out = (Hp - filt_size) // stride + 1
    W_out = (Wp - filt_size) // stride + 1

    def fold(n, n_out):
        # sel[o, p] = a[i] at padded position p = stride*o + i   (blur + stride)
        sel = np.zeros((n_out, n + pad_lo + pad_hi))
        for o in range(n_out):
            for i in range(filt_size):
                sel[o, stride * o + i] += a[i]
        # rep[p, x] = 1 where padded index p replicates original index x
        rep = np.zeros((n + pad_lo + pad_hi, n))
        for p in range(n + pad_lo + pad_hi):
            rep[p, min(max(p - pad_lo, 0), n - 1)] = 1.0
        return sel @ rep  # (n_out, n)

    A = fold(H, H_out)   # (H_out, H)
    Bm = fold(W, W_out)  # (W_out, W)
    # K[(h, w), (o, m)] = A[o, h] * Bm[m, w]
    K = np.einsum("oh,mw->hwom", A, Bm).reshape(H * W, H_out * W_out)
    return jnp.asarray(K, dtype=jnp.float32), H_out, W_out


def _pick_group(d_out, ow, max_group=8):
    """Smallest divisor G of d_out such that G*ow >= 128 lanes (capped); 1 if not needed."""
    if ow >= 128 or d_out <= 1:
        return 1
    target = -(-128 // ow)
    divisors = [g for g in range(1, min(d_out, max_group) + 1) if d_out % g == 0]
    for g in divisors:
        if g >= target:
            return g
    return divisors[-1]


def _pick_tb(B, HW, GOW, G, itemsize, k_buf_bytes, budget=_VMEM_BUDGET):
    """Largest (n, c)-row tile: multiple of the sublane pack, <= B, such that all
    double-buffered input/output blocks plus K fit within the VMEM budget."""
    pack = max(8, 32 // max(1, itemsize))   # 8 for f32, 16 for bf16, 32 for int8
    if B <= pack:
        return B                            # single full-dim block
    per_row = 2 * G * HW * itemsize + 2 * GOW * itemsize
    avail = max(per_row * pack, budget - k_buf_bytes)
    tb = (avail // per_row) // pack * pack
    return int(max(pack, min(tb, (B // pack) * pack, 4096)))


def _make_kernel(G, OW):
    def kernel(*refs):
        # refs = (x_ref_0 .. x_ref_{G-1}, k_ref, o_ref)
        #   x_ref_g: (TB, HW)   native dtype, one selected input depth per output depth
        #   k_ref:   (HW, OW)   blur + stride + replicate pad folded; constant index_map
        #   o_ref:   (TB, G*OW) lane-dense grouped output block
        x_refs, k_ref, o_ref = refs[:G], refs[G], refs[G + 1]
        k = k_ref[...]
        parts = []
        for g in range(G):
            xg = x_refs[g][...]
            if xg.dtype != k.dtype:          # static (trace-time) check; no-op for f32/bf16
                xg = xg.astype(k.dtype)
            y = jnp.dot(xg, k, preferred_element_type=jnp.float32)
            parts.append(y.astype(o_ref.dtype))
        o_ref[...] = parts[0] if G == 1 else jnp.concatenate(parts, axis=-1)
    return kernel


def downsample(x, filt_size=3, stride=2, pad_off=0):
    """Equivalent of Downsample(C, pad_type='repl', filt_size, stride).forward(x).

    x: (N, C, D, H, W). Returns (N, C, D_out, H_out, W_out).
    """
    assert filt_size in _BINOMIAL and filt_size >= 2, "filt_size == 1 path not implemented"
    # TODO(synk): filt_size == 1 path (pure strided slicing of dims 2, 3) not implemented.
    assert pad_off == 0

    N, C, D, H, W = x.shape
    pad_lo = (filt_size - 1) // 2
    pad_hi = -(-(filt_size - 1) // 2)  # ceil

    K, H_out, W_out = _spatial_weight(H, W, filt_size, stride, pad_lo, pad_hi)
    D_out = (D + pad_lo + pad_hi - 1) // stride + 1  # conv kernel depth == 1

    # Native-dtype MXU path: pre-cast K to bf16 for bf16 inputs (f32 accumulation keeps
    # precision); otherwise keep K in f32.
    if x.dtype == jnp.bfloat16:
        K = K.astype(jnp.bfloat16)

    B = N * C
    HW = H * W
    OW = H_out * W_out

    # TODO(synk): for very large spatial extents switch to a separable two-stage
    # (row blur / column blur) kernel; the fused K scales as (H*W) x (H_out*W_out).
    assert HW * OW * K.dtype.itemsize <= (2 << 20), \
        "spatial extent too large for the fused-weight kernel"

    # Lane-densify the output: group G output depths per grid step when OW < 128.
    G = _pick_group(D_out, OW)
    GOW = G * OW
    n_dg = D_out // G

    k_buf_bytes = 2 * int(K.size) * K.dtype.itemsize  # K is double-buffered by default
    itemsize = x.dtype.itemsize
    TB = _pick_tb(B, HW, GOW, G, itemsize, k_buf_bytes)
    nb = pl.cdiv(B, TB)  # TB need not divide B; boundary block is masked

    # Free reshapes only (merge / insert contiguous unit dims): no HBM copies in the
    # wrapper.  The trailing unit dim keeps each block's last-two dims equal to the
    # full array dims (TPU tiling constraint) while the kernel sees lane-dense views.
    xr = x.reshape(B, D, 1, HW)

    def make_x_map(g):
        def x_map(b, dg):
            # Output depth dg*G + g reads padded depth d*stride -> clamp to input range
            # (replicate padding along depth folded into the index_map).
            d = (dg * G + g) * stride - pad_lo
            d_in = jnp.minimum(jnp.maximum(d, 0), D - 1)
            return (b, d_in, 0, 0)
        return x_map

    in_specs = [pl.BlockSpec((TB, None, None, HW), make_x_map(g)) for g in range(G)]
    # K has a constant index_map so it is fetched once; its (double-buffered) footprint
    # is bounded by the assert above and accounted for in the TB budget.
    in_specs.append(pl.BlockSpec((HW, OW), lambda b, dg: (0, 0)))

    # Raise the scoped-VMEM limit only when the chosen blocks actually need it, so small
    # problems keep the platform default (safe across TPU generations).
    need = 2 * G * TB * HW * itemsize + 2 * TB * GOW * itemsize + k_buf_bytes
    vmem_limit = int(min(need + (8 << 20), 56 << 20)) if need > (12 << 20) else None

    cost = pl.CostEstimate(
        flops=2 * B * D_out * HW * OW,
        transcendentals=0,
        bytes_accessed=B * D_out * (HW + OW) * itemsize + int(K.size) * K.dtype.itemsize,
    )

    out = pl.pallas_call(
        _make_kernel(G, OW),
        out_shape=jax.ShapeDtypeStruct((B, n_dg, 1, GOW), x.dtype),
        grid=(nb, n_dg),
        in_specs=in_specs,
        out_specs=pl.BlockSpec((TB, None, None, GOW), lambda b, dg: (b, dg, 0, 0)),
        compiler_params=pltpu.CompilerParams(
            dimension_semantics=("parallel", "parallel"),
            vmem_limit_bytes=vmem_limit,
        ),
        cost_estimate=cost,
    )(*([xr] * G), K)

    return out.reshape(N, C, D_out, H_out, W_out)


def _reference(x, filt_size=3, stride=2):
    """Pure-JAX reference mirroring F.conv3d(ReplicationPad3d(x), filt, stride, groups=C)."""
    N, C, D, H, W = x.shape
    pad_lo = (filt_size - 1) // 2
    pad_hi = -(-(filt_size - 1) // 2)
    xp = jnp.pad(
        x.astype(jnp.float32),
        ((0, 0), (0, 0), (pad_lo, pad_hi), (pad_lo, pad_hi), (pad_lo, pad_hi)),
        mode="edge",
    )
    xp = xp[:, :, ::stride]  # conv kernel depth == 1
    Hp, Wp = H + pad_lo + pad_hi, W + pad_lo + pad_hi
    H_out = (Hp - filt_size) // stride + 1
    W_out = (Wp - filt_size) // stride + 1
    a = np.asarray(_BINOMIAL[filt_size], dtype=np.float64)
    a = a / a.sum()
    f2d = jnp.asarray(np.outer(a, a), jnp.float32)
    out = jnp.zeros(xp.shape[:3] + (H_out, W_out), jnp.float32)
    for i in range(filt_size):
        for j in range(filt_size):
            sl = xp[:, :, :, i:i + stride * H_out:stride, j:j + stride * W_out:stride]
            out = out + f2d[i, j] * sl
    return out.astype(x.dtype)


if __name__ == "__main__":
    key = jax.random.PRNGKey(0)
    N, C, D, H, W = 2, 4, 8, 16, 16
    x = jax.random.normal(key, (N, C, D, H, W), dtype=jnp.float32)

    # f32 path
    out = jax.block_until_ready(downsample(x, filt_size=3, stride=2))
    ref = _reference(x, filt_size=3, stride=2)
    assert out.shape == ref.shape, (out.shape, ref.shape)
    assert jnp.allclose(out, ref, atol=1e-5, rtol=1e-5), \
        float(jnp.max(jnp.abs(out - ref)))

    # bf16 path (native bf16 MXU matmul, K pre-cast to bf16): looser tolerance.
    xb = x.astype(jnp.bfloat16)
    outb = jax.block_until_ready(downsample(xb, filt_size=3, stride=2))
    refb = _reference(xb, filt_size=3, stride=2)
    assert outb.shape == refb.shape, (outb.shape, refb.shape)
    assert jnp.allclose(outb.astype(jnp.float32), refb.astype(jnp.float32),
                        atol=3e-2, rtol=3e-2), \
        float(jnp.max(jnp.abs(outb.astype(jnp.float32) - refb.astype(jnp.float32))))

    print("KERNEL_OK")
</pallas_src>

<mosaic_0001>
module attributes {stable_mosaic.version = 11 : i64} {
  func.func @kernel(%arg0: i32, %arg1: i32, %arg2: memref<8x1x1x256xf32, #tpu.memory_space<vmem>>, %arg3: memref<8x1x1x256xf32, #tpu.memory_space<vmem>>, %arg4: memref<8x1x1x256xf32, #tpu.memory_space<vmem>>, %arg5: memref<8x1x1x256xf32, #tpu.memory_space<vmem>>, %arg6: memref<8x1x1x256xf32, #tpu.memory_space<vmem>>, %arg7: memref<256x64xf32, #tpu.memory_space<vmem>>, %arg8: memref<8x1x1x320xf32, #tpu.memory_space<vmem>>) attributes {dimension_semantics = [#tpu.dimension_semantics<parallel>, #tpu.dimension_semantics<parallel>], iteration_bounds = array<i64: 1, 1>, scalar_prefetch = 0 : i64, scratch_operands = 0 : i64, tpu.core_type = #tpu.core_type<tc>, window_params = [{transform_indices = @transform_0, window_bounds = array<i64: 8, 1, 1, 256>}, {transform_indices = @transform_1, window_bounds = array<i64: 8, 1, 1, 256>}, {transform_indices = @transform_2, window_bounds = array<i64: 8, 1, 1, 256>}, {transform_indices = @transform_3, window_bounds = array<i64: 8, 1, 1, 256>}, {transform_indices = @transform_4, window_bounds = array<i64: 8, 1, 1, 256>}, {pipeline_mode = #tpu.pipeline_mode<synchronous>, transform_indices = @transform_5, window_bounds = array<i64: 256, 64>}, {transform_indices = @transform_6, window_bounds = array<i64: 8, 1, 1, 320>}]} {
    %c0 = arith.constant 0 : index
    %c0_0 = arith.constant 0 : index
    %0 = vector.load %arg7[%c0, %c0_0] : memref<256x64xf32, #tpu.memory_space<vmem>>, vector<256x64xf32>
    %c0_1 = arith.constant 0 : index
    %c0_2 = arith.constant 0 : index
    %c0_3 = arith.constant 0 : index
    %c0_4 = arith.constant 0 : index
    %1 = vector.load %arg2[%c0_1, %c0_2, %c0_3, %c0_4] : memref<8x1x1x256xf32, #tpu.memory_space<vmem>>, vector<8x1x1x256xf32>
    %2 = vector.shape_cast %1 : vector<8x1x1x256xf32> to vector<8x256xf32>
    %cst = arith.constant dense<0.000000e+00> : vector<8x64xf32>
    %3 = tpu.matmul %2, %0, %cst {dimension_numbers = #tpu.dot_dimension_numbers<[1], [0], [0], [1], [0, 0, 1, 1], [], []>} : vector<8x256xf32>, vector<256x64xf32>, vector<8x64xf32> -> vector<8x64xf32>
    %c0_5 = arith.constant 0 : index
    %c0_6 = arith.constant 0 : index
    %c0_7 = arith.constant 0 : index
    %c0_8 = arith.constant 0 : index
    %4 = vector.load %arg3[%c0_5, %c0_6, %c0_7, %c0_8] : memref<8x1x1x256xf32, #tpu.memory_space<vmem>>, vector<8x1x1x256xf32>
    %5 = vector.shape_cast %4 : vector<8x1x1x256xf32> to vector<8x256xf32>
    %cst_9 = arith.constant dense<0.000000e+00> : vector<8x64xf32>
    %6 = tpu.matmul %5, %0, %cst_9 {dimension_numbers = #tpu.dot_dimension_numbers<[1], [0], [0], [1], [0, 0, 1, 1], [], []>} : vector<8x256xf32>, vector<256x64xf32>, vector<8x64xf32> -> vector<8x64xf32>
    %c0_10 = arith.constant 0 : index
    %c0_11 = arith.constant 0 : index
    %c0_12 = arith.constant 0 : index
    %c0_13 = arith.constant 0 : index
    %7 = vector.load %arg4[%c0_10, %c0_11, %c0_12, %c0_13] : memref<8x1x1x256xf32, #tpu.memory_space<vmem>>, vector<8x1x1x256xf32>
    %8 = vector.shape_cast %7 : vector<8x1x1x256xf32> to vector<8x256xf32>
    %cst_14 = arith.constant dense<0.000000e+00> : vector<8x64xf32>
    %9 = tpu.matmul %8, %0, %cst_14 {dimension_numbers = #tpu.dot_dimension_numbers<[1], [0], [0], [1], [0, 0, 1, 1], [], []>} : vector<8x256xf32>, vector<256x64xf32>, vector<8x64xf32> -> vector<8x64xf32>
    %c0_15 = arith.constant 0 : index
    %c0_16 = arith.constant 0 : index
    %c0_17 = arith.constant 0 : index
    %c0_18 = arith.constant 0 : index
    %10 = vector.load %arg5[%c0_15, %c0_16, %c0_17, %c0_18] : memref<8x1x1x256xf32, #tpu.memory_space<vmem>>, vector<8x1x1x256xf32>
    %11 = vector.shape_cast %10 : vector<8x1x1x256xf32> to vector<8x256xf32>
    %cst_19 = arith.constant dense<0.000000e+00> : vector<8x64xf32>
    %12 = tpu.matmul %11, %0, %cst_19 {dimension_numbers = #tpu.dot_dimension_numbers<[1], [0], [0], [1], [0, 0, 1, 1], [], []>} : vector<8x256xf32>, vector<256x64xf32>, vector<8x64xf32> -> vector<8x64xf32>
    %c0_20 = arith.constant 0 : index
    %c0_21 = arith.constant 0 : index
    %c0_22 = arith.constant 0 : index
    %c0_23 = arith.constant 0 : index
    %13 = vector.load %arg6[%c0_20, %c0_21, %c0_22, %c0_23] : memref<8x1x1x256xf32, #tpu.memory_space<vmem>>, vector<8x1x1x256xf32>
    %14 = vector.shape_cast %13 : vector<8x1x1x256xf32> to vector<8x256xf32>
    %cst_24 = arith.constant dense<0.000000e+00> : vector<8x64xf32>
    %15 = tpu.matmul %14, %0, %cst_24 {dimension_numbers = #tpu.dot_dimension_numbers<[1], [0], [0], [1], [0, 0, 1, 1], [], []>} : vector<8x256xf32>, vector<256x64xf32>, vector<8x64xf32> -> vector<8x64xf32>
    %16 = tpu.concatenate %3, %6, %9, %12, %15 in 1 : vector<8x64xf32>, vector<8x64xf32>, vector<8x64xf32>, vector<8x64xf32>, vector<8x64xf32> -> vector<8x320xf32>
    %c0_25 = arith.constant 0 : index
    %c0_26 = arith.constant 0 : index
    %c0_27 = arith.constant 0 : index
    %c0_28 = arith.constant 0 : index
    %17 = vector.load %arg8[%c0_25, %c0_26, %c0_27, %c0_28] : memref<8x1x1x320xf32, #tpu.memory_space<vmem>>, vector<8x1x1x320xf32>
    %18 = vector.shape_cast %17 : vector<8x1x1x320xf32> to vector<8x320xf32>
    %19 = vector.shape_cast %16 : vector<8x320xf32> to vector<8x1x1x320xf32>
    tpu.vector_store %arg8[%c0_25, %c0_26, %c0_27, %c0_28], %19 {strides = array<i32>} : memref<8x1x1x320xf32, #tpu.memory_space<vmem>>, vector<8x1x1x320xf32>,
    return
  }
  func.func @transform_0(%arg0: i32, %arg1: i32) -> (i32, i32, i32, i32) {
    %c5_i32 = arith.constant 5 : i32
    %0 = arith.muli %arg1, %c5_i32 : i32
    %c0_i32 = arith.constant 0 : i32
    %1 = arith.addi %0, %c0_i32 : i32
    %c2_i32 = arith.constant 2 : i32
    %2 = arith.muli %1, %c2_i32 : i32
    %c1_i32 = arith.constant 1 : i32
    %3 = arith.subi %2, %c1_i32 : i32
    %c0_i32_0 = arith.constant 0 : i32
    %4 = arith.maxsi %3, %c0_i32_0 : i32
    %c7_i32 = arith.constant 7 : i32
    %5 = arith.minsi %4, %c7_i32 : i32
    %c0_i32_1 = arith.constant 0 : i32
    %c0_i32_2 = arith.constant 0 : i32
    %c0_i32_3 = arith.constant 0 : i32
    return %arg0, %5, %c0_i32_1, %c0_i32_2 : i32, i32, i32, i32
  }
  func.func @transform_1(%arg0: i32, %arg1: i32) -> (i32, i32, i32, i32) {
    %c5_i32 = arith.constant 5 : i32
    %0 = arith.muli %arg1, %c5_i32 : i32
    %c1_i32 = arith.constant 1 : i32
    %1 = arith.addi %0, %c1_i32 : i32
    %c2_i32 = arith.constant 2 : i32
    %2 = arith.muli %1, %c2_i32 : i32
    %c1_i32_0 = arith.constant 1 : i32
    %3 = arith.subi %2, %c1_i32_0 : i32
    %c0_i32 = arith.constant 0 : i32
    %4 = arith.maxsi %3, %c0_i32 : i32
    %c7_i32 = arith.constant 7 : i32
    %5 = arith.minsi %4, %c7_i32 : i32
    %c0_i32_1 = arith.constant 0 : i32
    %c0_i32_2 = arith.constant 0 : i32
    %c0_i32_3 = arith.constant 0 : i32
    return %arg0, %5, %c0_i32_1, %c0_i32_2 : i32, i32, i32, i32
  }
  func.func @transform_2(%arg0: i32, %arg1: i32) -> (i32, i32, i32, i32) {
    %c5_i32 = arith.constant 5 : i32
    %0 = arith.muli %arg1, %c5_i32 : i32
    %c2_i32 = arith.constant 2 : i32
    %1 = arith.addi %0, %c2_i32 : i32
    %c2_i32_0 = arith.constant 2 : i32
    %2 = arith.muli %1, %c2_i32_0 : i32
    %c1_i32 = arith.constant 1 : i32
    %3 = arith.subi %2, %c1_i32 : i32
    %c0_i32 = arith.constant 0 : i32
    %4 = arith.maxsi %3, %c0_i32 : i32
    %c7_i32 = arith.constant 7 : i32
    %5 = arith.minsi %4, %c7_i32 : i32
    %c0_i32_1 = arith.constant 0 : i32
    %c0_i32_2 = arith.constant 0 : i32
    %c0_i32_3 = arith.constant 0 : i32
    return %arg0, %5, %c0_i32_1, %c0_i32_2 : i32, i32, i32, i32
  }
  func.func @transform_3(%arg0: i32, %arg1: i32) -> (i32, i32, i32, i32) {
    %c5_i32 = arith.constant 5 : i32
    %0 = arith.muli %arg1, %c5_i32 : i32
    %c3_i32 = arith.constant 3 : i32
    %1 = arith.addi %0, %c3_i32 : i32
    %c2_i32 = arith.constant 2 : i32
    %2 = arith.muli %1, %c2_i32 : i32
    %c1_i32 = arith.constant 1 : i32
    %3 = arith.subi %2, %c1_i32 : i32
    %c0_i32 = arith.constant 0 : i32
    %4 = arith.maxsi %3, %c0_i32 : i32
    %c7_i32 = arith.constant 7 : i32
    %5 = arith.minsi %4, %c7_i32 : i32
    %c0_i32_0 = arith.constant 0 : i32
    %c0_i32_1 = arith.constant 0 : i32
    %c0_i32_2 = arith.constant 0 : i32
    return %arg0, %5, %c0_i32_0, %c0_i32_1 : i32, i32, i32, i32
  }
  func.func @transform_4(%arg0: i32, %arg1: i32) -> (i32, i32, i32, i32) {
    %c5_i32 = arith.constant 5 : i32
    %0 = arith.muli %arg1, %c5_i32 : i32
    %c4_i32 = arith.constant 4 : i32
    %1 = arith.addi %0, %c4_i32 : i32
    %c2_i32 = arith.constant 2 : i32
    %2 = arith.muli %1, %c2_i32 : i32
    %c1_i32 = arith.constant 1 : i32
    %3 = arith.subi %2, %c1_i32 : i32
    %c0_i32 = arith.constant 0 : i32
    %4 = arith.maxsi %3, %c0_i32 : i32
    %c7_i32 = arith.constant 7 : i32
    %5 = arith.minsi %4, %c7_i32 : i32
    %c0_i32_0 = arith.constant 0 : i32
    %c0_i32_1 = arith.constant 0 : i32
    %c0_i32_2 = arith.constant 0 : i32
    return %arg0, %5, %c0_i32_0, %c0_i32_1 : i32, i32, i32, i32
  }
  func.func @transform_5(%arg0: i32, %arg1: i32) -> (i32, i32) {
    %c0_i32 = arith.constant 0 : i32
    %c0_i32_0 = arith.constant 0 : i32
    %c0_i32_1 = arith.constant 0 : i32
    return %c0_i32, %c0_i32_0 : i32, i32
  }
  func.func @transform_6(%arg0: i32, %arg1: i32) -> (i32, i32, i32, i32) {
    %c0_i32 = arith.constant 0 : i32
    %c0_i32_0 = arith.constant 0 : i32
    %c0_i32_1 = arith.constant 0 : i32
    return %arg0, %arg1, %c0_i32, %c0_i32_0 : i32, i32, i32, i32
  }
}

</mosaic_0001>

<bundles_post_ra>
// kernel: tpu_custom_call.1
= control target key start
LH: loop header
LB: loop body
LE: loop exit
PB: predicated region body
PF: predicated region fallthrough
CT: control target
= control target key end

     0   :  { %11 = vsyncpa [#allocation6], 0  ;;  %s2213_s0 = inlined_call_operand.vmem [shape: f32[8,8,1,256], index: 0, kind: input, shape index: {}]   ;;  %s2214_s1 = inlined_call_operand.vmem [shape: f32[8,8,1,256], index: 1, kind: input, shape index: {}]   ;;  %s2215_s2 = inlined_call_operand.vmem [shape: f32[8,8,1,256], index: 2, kind: input, shape index: {}]   ;;  %s2216_s3 = inlined_call_operand.hbm [shape: f32[8,8,1,256], index: 3, kind: input, shape index: {}]   ;;  %s2217_s4 = inlined_call_operand.hbm [shape: f32[8,8,1,256], index: 4, kind: input, shape index: {}]   ;;  %s2218_s5 = inlined_call_operand.vmem [shape: f32[256,64], index: 5, kind: input, shape index: {}]   ;;  %s2219_s6 = inlined_call_operand.hbm [shape: f32[8,1,1,320], index: 6, kind: output, shape index: {}]  }
   0x1   :  { %12 = vsyncpa [#allocation9], 0 }
   0x2   :  { %13 = vsyncpa [#allocation7], 0  ;;  %v39_v0 = vld [vmem:[%s2213_s0] sm:$0x3]  ;;  %v41_v1 = vld [vmem:[%s2213_s0 + $0x10] sm:$0x3] }
   0x3   :  { %40 = vst [vmem:[#allocation2] sm:$0x3] %v39_v0  ;;  %42 = vst [vmem:[#allocation2 + $0x2] sm:$0x3] %v41_v1  ;;  %v43_v2 = vld [vmem:[%s2213_s0 + $0x20] sm:$0x3] }
   0x4   :  { %v45_v3 = vld [vmem:[%s2213_s0 + $0x30] sm:$0x3]  ;;  %v47_v4 = vld [vmem:[%s2213_s0 + $0x40] sm:$0x3]  ;;  %44 = vst [vmem:[#allocation2 + $0x4] sm:$0x3] %v43_v2 }
   0x5   :  { %46 = vst [vmem:[#allocation2 + $0x6] sm:$0x3] %v45_v3  ;;  %48 = vst [vmem:[#allocation2 + $0x8] sm:$0x3] %v47_v4  ;;  %v49_v5 = vld [vmem:[%s2213_s0 + $0x50] sm:$0x3] }
   0x6   :  { %v51_v6 = vld [vmem:[%s2213_s0 + $0x60] sm:$0x3]  ;;  %v53_v7 = vld [vmem:[%s2213_s0 + $0x70] sm:$0x3]  ;;  %50 = vst [vmem:[#allocation2 + $0xa] sm:$0x3] %v49_v5 }
   0x7   :  { %52 = vst [vmem:[#allocation2 + $0xc] sm:$0x3] %v51_v6  ;;  %54 = vst [vmem:[#allocation2 + $0xe] sm:$0x3] %v53_v7  ;;  %v1290_v8 = vld [vmem:[%s2214_s1 + $0x2] sm:$0x3] }
   0x8   :  { %v1291_v9 = vld [vmem:[%s2214_s1 + $0x12] sm:$0x3]  ;;  %v1292_v10 = vld [vmem:[%s2214_s1 + $0x22] sm:$0x3]  ;;  %119 = vst [vmem:[#allocation3] sm:$0x3] %v1290_v8 }
   0x9   :  { %121 = vst [vmem:[#allocation3 + $0x2] sm:$0x3] %v1291_v9  ;;  %123 = vst [vmem:[#allocation3 + $0x4] sm:$0x3] %v1292_v10  ;;  %v1293_v11 = vld [vmem:[%s2214_s1 + $0x32] sm:$0x3] }
   0xa   :  { %v1294_v12 = vld [vmem:[%s2214_s1 + $0x42] sm:$0x3]  ;;  %v1295_v13 = vld [vmem:[%s2214_s1 + $0x52] sm:$0x3]  ;;  %125 = vst [vmem:[#allocation3 + $0x6] sm:$0x3] %v1293_v11 }
   0xb   :  { %127 = vst [vmem:[#allocation3 + $0x8] sm:$0x3] %v1294_v12  ;;  %129 = vst [vmem:[#allocation3 + $0xa] sm:$0x3] %v1295_v13  ;;  %v1296_v14 = vld [vmem:[%s2214_s1 + $0x62] sm:$0x3] }
   0xc   :  { %v1297_v15 = vld [vmem:[%s2214_s1 + $0x72] sm:$0x3]  ;;  %v1298_v16 = vld [vmem:[%s2215_s2 + $0x6] sm:$0x3]  ;;  %131 = vst [vmem:[#allocation3 + $0xc] sm:$0x3] %v1296_v14 }
   0xd   :  { %133 = vst [vmem:[#allocation3 + $0xe] sm:$0x3] %v1297_v15  ;;  %198 = vst [vmem:[#allocation4] sm:$0x3] %v1298_v16  ;;  %v1299_v17 = vld [vmem:[%s2215_s2 + $0x16] sm:$0x3] }
   0xe   :  { %v1300_v18 = vld [vmem:[%s2215_s2 + $0x26] sm:$0x3]  ;;  %v1301_v19 = vld [vmem:[%s2215_s2 + $0x36] sm:$0x3]  ;;  %200 = vst [vmem:[#allocation4 + $0x2] sm:$0x3] %v1299_v17 }
   0xf   :  { %202 = vst [vmem:[#allocation4 + $0x4] sm:$0x3] %v1300_v18  ;;  %204 = vst [vmem:[#allocation4 + $0x6] sm:$0x3] %v1301_v19  ;;  %v1302_v20 = vld [vmem:[%s2215_s2 + $0x46] sm:$0x3] }
  0x10   :  { %v1303_v21 = vld [vmem:[%s2215_s2 + $0x56] sm:$0x3]  ;;  %v1304_v22 = vld [vmem:[%s2215_s2 + $0x66] sm:$0x3]  ;;  %206 = vst [vmem:[#allocation4 + $0x8] sm:$0x3] %v1302_v20 }
  0x11   :  { %208 = vst [vmem:[#allocation4 + $0xa] sm:$0x3] %v1303_v21  ;;  %210 = vst [vmem:[#allocation4 + $0xc] sm:$0x3] %v1304_v22  ;;  %v1305_v23 = vld [vmem:[%s2215_s2 + $0x76] sm:$0x3] }
  0x12   :  { %s264_s20 = scalar_lea.hbm %s2216_s3, 160  ;;  %212 = vst [vmem:[#allocation4 + $0xe] sm:$0x3] %v1305_v23  ;;  %s1729_s21 = smov [#allocation5]  }
  0x13   :  { %s265_s22 = sshll.u32 %s1729_s21, 4  ;;  %s1675_s25 = scalar_lea.hbm %s2216_s3, 416  ;;  %s266_s22 = int_to_ptr.vmem [resolvable:$true] %s265_s22 }
  0x14   :  { %p1652_p0 = scmp.ne.s32.totalorder %s264_s20, %s1675_s25  ;;  %s1653_s28 = scalar_lea.hbm %s2216_s3, 2048 }
  0x15   :  { %p1654_p1 = scmp.lt.u32.totalorder %s264_s20, %s2216_s3  ;;  %p1655_p2 = scmp.lt.u32.totalorder %s1653_s28, %s1675_s25 }
  0x16   :  { %p1657_p4 = scmp.lt.u32.totalorder %s1675_s25, %s264_s20 }
  0x17   :  { %p1656_p3 = por %p1655_p2, %p1654_p1 }
  0x19   :  { %p1658_p5 = por %p1657_p4, %p1656_p3 }
  0x1b   :  { %p1659_p6 = pnand %p1658_p5, %p1652_p0 }
  0x1d   :  { %1662 = shalt.err (!%p1659_p6)
}
  0x1e   :  { %s1663_s2 = scalar_lea.vmem %s266_s22, 256  ;;  %p1668_p8 = scmp.lt.s32.totalorder %s266_s22, %s266_s22 }
  0x1f   :  { %p1664_p7 = scmp.ne.s32.totalorder %s266_s22, %s1663_s2  ;;  %p1669_p9 = scmp.lt.s32.totalorder %s1663_s2, %s1663_s2 }
  0x21   :  { %p1670_p10 = por %p1669_p9, %p1668_p8 }
  0x23   :  { %p1671_p11 = pnand %p1670_p10, %p1664_p7 }
  0x25   :  { %1674 = shalt.err (!%p1671_p11)
}
  0x26   :  { %s1730_s7 = smov 256   ;;  %s1731_s8 = smov 32  }
  0x27   :  { %s1732_s9 = smov 2   ;;  %s287_s3 = scalar_lea.hbm %s2217_s4, 224 }
  0x28   :  { %271 = dma.hbm_to_vmem [thread:$0]  %s264_s20, 256, %s266_s22, [#allocation6], %s1730_s7, %s1731_s8, %s1732_s9  }
  0x29   :  { %s1733_s1 = smov [#allocation8]   ;;  %s1700_s15 = scalar_lea.hbm %s2217_s4, 480 }
  0x2a   :  { %s288_s12 = sshll.u32 %s1733_s1, 4  ;;  %p1677_p12 = scmp.ne.s32.totalorder %s287_s3, %s1700_s15  ;;  %s289_s12 = int_to_ptr.vmem [resolvable:$true] %s288_s12 }
  0x2b   :  { %s1678_s18 = scalar_lea.hbm %s2217_s4, 2048  ;;  %p1679_p13 = scmp.lt.u32.totalorder %s287_s3, %s2217_s4 }
  0x2c   :  { %p1680_p0 = scmp.lt.u32.totalorder %s1678_s18, %s1700_s15  ;;  %p1682_p2 = scmp.lt.u32.totalorder %s1700_s15, %s287_s3 }
  0x2e   :  { %p1681_p1 = por %p1680_p0, %p1679_p13 }
  0x30   :  { %p1683_p3 = por %p1682_p2, %p1681_p1 }
  0x32   :  { %p1684_p4 = pnand %p1683_p3, %p1677_p12 }
  0x34   :  { %1687 = shalt.err (!%p1684_p4)
}
  0x35   :  { %s1688_s20 = scalar_lea.vmem %s289_s12, 256  ;;  %p1693_p6 = scmp.lt.s32.totalorder %s289_s12, %s289_s12 }
  0x36   :  { %p1689_p5 = scmp.ne.s32.totalorder %s289_s12, %s1688_s20  ;;  %p1694_p7 = scmp.lt.s32.totalorder %s1688_s20, %s1688_s20 }
  0x38   :  { %p1695_p8 = por %p1694_p7, %p1693_p6 }
  0x3a   :  { %p1696_p9 = pnand %p1695_p8, %p1689_p5 }
  0x3c   :  { %1699 = shalt.err (!%p1696_p9)
}
  0x3d   :  { %294 = dma.hbm_to_vmem [thread:$0]  %s287_s3, 256, %s289_s12, [#allocation9], %s1730_s7, %s1731_s8, %s1732_s9  }
  0x3e   :  { %1723 = dma.done.wait [#allocation6], 256  }
  0x3f   :  { %1724 = vsyncadd [#allocation6], 4294967040 }
  0x40   :  { %1725 = dma.done.wait [#allocation9], 256  }
  0x41   :  { %1726 = vsyncadd [#allocation9], 4294967040  ;;  %v363_v24 = vld [vmem:[%s2218_s5 + $0x80] sm:$0xff]  ;;  %v364_v25 = vld [vmem:[%s2218_s5 + $0x88] sm:$0xff]  ;;  %v1734_v36 = vmov 1966171168   ;;  %v402_v38 = vlaneseq }
  0x42   :  { %v347_v26 = vld [vmem:[%s2218_s5] sm:$0xff]  ;;  %v1879_v27 = vpack.c.bf16 %v364_v25, %v363_v24  ;;  %v348_v28 = vld [vmem:[%s2218_s5 + $0x8] sm:$0xff]  ;;  %v365_v29 = vld [vmem:[%s2218_s5 + $0x90] sm:$0xff]  ;;  %v400_v37 = vunpack.c.l.s4 %v1734_v36  ;;  %vm1157_vm0 = vcmask 523264   ;;  %s1736_s26 = smov [#allocation10]  }
  0x43   :  { %v366_v30 = vld [vmem:[%s2218_s5 + $0x98] sm:$0xff]  ;;  %v1890_v31 = vpack.c.bf16 %v348_v28, %v347_v26  ;;  %v349_v33 = vld [vmem:[%s2218_s5 + $0x10] sm:$0xff]  ;;  %v367_v35 = vld [vmem:[%s2218_s5 + $0xa0] sm:$0xff]  ;;  %v403_v47 = vshrl.u32 %v402_v38, 7  ;;  %s1255_s27 = sshll.u32 %s1736_s26, 4  ;;  %vm2170_vm1 = vcmp.lt.s32.totalorder %v402_v38, 320  ;;  %s2178_s27 = int_to_ptr.vmem [resolvable:$true] %s1255_s27 }
  0x44   :  { %v1892_v32 = vpack.c.bf16 %v366_v30, %v365_v29  ;;  %v350_v34 = vld [vmem:[%s2218_s5 + $0x18] sm:$0xff]  ;;  %1514 = vmatprep.subr.bf16.mxu1 %v1879_v27  ;;  %v368_v39 = vld [vmem:[%s2218_s5 + $0xa8] sm:$0xff]  ;;  %1482 = vmatprep.subr.bf16.mxu0 %v1879_v27  ;;  %v351_v42 = vld [vmem:[%s2218_s5 + $0x20] sm:$0xff]  ;;  %v401_v46 = vunpack.c.0.s8 %v400_v37  ;;  %s1701_s28 = scalar_lea.vmem %s2178_s27, 384  ;;  %p1706_p11 = scmp.lt.s32.totalorder %s2178_s27, %s2178_s27 }
  0x45   :  { %1516 = vmatpush3.bf16.msra.mxu1 %v1890_v31  ;;  %v1909_v40 = vpack.c.bf16 %v350_v34, %v349_v33  ;;  %1484 = vmatpush3.bf16.msra.mxu0 %v1890_v31  ;;  %v1913_v41 = vpack.c.bf16 %v368_v39, %v367_v35  ;;  %v352_v43 = vld [vmem:[%s2218_s5 + $0x28] sm:$0xff]  ;;  %v369_v44 = vld [vmem:[%s2218_s5 + $0xb0] sm:$0xff]  ;;  %v370_v45 = vld [vmem:[%s2218_s5 + $0xb8] sm:$0xff]  ;;  %p1702_p10 = scmp.ne.s32.totalorder %s2178_s27, %s1701_s28  ;;  %p1707_p12 = scmp.lt.s32.totalorder %s1701_s28, %s1701_s28 }
  0x46   :  { %1518 = vmatprep.subr.bf16.mxu1 %v1892_v32  ;;  %1486 = vmatprep.subr.bf16.mxu0 %v1892_v32  ;;  %v1930_v48 = vpack.c.bf16 %v352_v43, %v351_v42  ;;  %v1934_v49 = vpack.c.bf16 %v370_v45, %v369_v44  ;;  %v353_v50 = vld [vmem:[%s2218_s5 + $0x30] sm:$0xff]  ;;  %v354_v51 = vld [vmem:[%s2218_s5 + $0x38] sm:$0xff]  ;;  %v371_v52 = vld [vmem:[%s2218_s5 + $0xc0] sm:$0xff]  ;;  %v1949_v54 = vsub.s32 %v401_v46, %v403_v47 }
  0x47   :  { %v372_v53 = vld [vmem:[%s2218_s5 + $0xc8] sm:$0xff]  ;;  %v533_v55 = vld [vmem:[#allocation3] sm:$0x3]  ;;  %v355_v56 = vld [vmem:[%s2218_s5 + $0x40] sm:$0xff]  ;;  %v1958_v61 = vpack.c.bf16 %v354_v51, %v353_v50  ;;  %p1708_p13 = por %p1707_p12, %p1706_p11 }
  0x48   :  { %v356_v57 = vld [vmem:[%s2218_s5 + $0x48] sm:$0xff]  ;;  %v534_v58 = vld [vmem:[#allocation3 + $0x2] sm:$0x3]  ;;  %v535_v59 = vld [vmem:[#allocation3 + $0x4] sm:$0x3]  ;;  %v1968_v5 = vpack.c.bf16 %v372_v53, %v371_v52 }
  0x49   :  { %1520 = vmatpush3.bf16.msra.mxu1 %v1909_v40  ;;  %1488 = vmatpush3.bf16.msra.mxu0 %v1909_v40  ;;  %v536_v60 = vld [vmem:[#allocation3 + $0x6] sm:$0x3]  ;;  %v374_v63 = vld [vmem:[%s2218_s5 + $0xd8] sm:$0xff]  ;;  %v549_v3 = vcombine.low %v533_v55, %v534_v58  ;;  %v841_v10 = vld [vmem:[#allocation5] sm:$0x3]  ;;  %v1993_v26 = vpack.c.bf16 %v356_v57, %v355_v56  ;;  %p1709_p0 = pnand %p1708_p13, %p1702_p10 }
  0x4a   :  { %1522 = vmatprep.subr.bf16.mxu1 %v1913_v41  ;;  %1490 = vmatprep.subr.bf16.mxu0 %v1913_v41  ;;  %v373_v62 = vld [vmem:[%s2218_s5 + $0xd0] sm:$0xff]  ;;  %v537_v0 = vld [vmem:[#allocation3 + $0x8] sm:$0x3]  ;;  %v538_v1 = vld [vmem:[#allocation3 + $0xa] sm:$0x3]  ;;  %v550_v4 = vcombine.low %v535_v59, %v536_v60 }
  0x4b   :  { %v539_v2 = vld [vmem:[#allocation3 + $0xc] sm:$0x3]  ;;  %v357_v6 = vld [vmem:[%s2218_s5 + $0x50] sm:$0xff]  ;;  %v540_v8 = vld [vmem:[#allocation3 + $0xe] sm:$0x3]  ;;  %v551_v9 = vcombine.low %v537_v0, %v538_v1  ;;  %v1978_v13 = vrot.slane %v549_v3, %v1949_v54  ;;  %v2011_v39 = vpack.c.bf16 %v374_v63, %v373_v62 }
  0x4c   :  { %v358_v7 = vld [vmem:[%s2218_s5 + $0x58] sm:$0xff]  ;;  %v842_v11 = vld [vmem:[#allocation5 + $0x2] sm:$0x3]  ;;  %v552_v12 = vcombine.low %v539_v2, %v540_v8  ;;  %v1981_v14 = vrot.slane %v550_v4, %v1949_v54  ;;  %v843_v15 = vld [vmem:[#allocation5 + $0x4] sm:$0x3] }
  0x4d   :  { %1524 = vmatpush3.bf16.msra.mxu1 %v1930_v48  ;;  %1492 = vmatpush3.bf16.msra.mxu0 %v1930_v48  ;;  %v844_v16 = vld [vmem:[#allocation5 + $0x6] sm:$0x3]  ;;  %v845_v17 = vld [vmem:[#allocation5 + $0x8] sm:$0x3]  ;;  %v375_v18 = vld [vmem:[%s2218_s5 + $0xe0] sm:$0xff]  ;;  %v1990_v20 = vrot.slane %v551_v9, %v1949_v54  ;;  %v857_v24 = vcombine.low %v841_v10, %v842_v11  ;;  %v2014_v46 = vpack.c.bf16 %v358_v7, %v357_v6 }
  0x4e   :  { %1526 = vmatprep.subr.bf16.mxu1 %v1934_v49  ;;  %1494 = vmatprep.subr.bf16.mxu0 %v1934_v49  ;;  %v376_v19 = vld [vmem:[%s2218_s5 + $0xe8] sm:$0xff]  ;;  %v846_v21 = vld [vmem:[#allocation5 + $0xa] sm:$0x3]  ;;  %v847_v22 = vld [vmem:[#allocation5 + $0xc] sm:$0x3]  ;;  %v858_v25 = vcombine.low %v843_v15, %v844_v16  ;;  %v580_v34 = vrot.slane %v552_v12, %v1949_v54  ;;  %v582_v35 = vcombine.high %v1978_v13, %v1981_v14 }
  0x4f   :  { %v848_v23 = vld [vmem:[#allocation5 + $0xe] sm:$0x3]  ;;  %v359_v28 = vld [vmem:[%s2218_s5 + $0x60] sm:$0xff]  ;;  %v360_v29 = vld [vmem:[%s2218_s5 + $0x68] sm:$0xff]  ;;  %v859_v36 = vcombine.low %v845_v17, %v846_v21  ;;  %v2026_v55 = vrot.slane %v857_v24, %v1949_v54  ;;  %v2038_v63 = vpack.c.bf16 %v376_v19, %v375_v18  ;;  %v581_v6 = vcombine.low %v1978_v13, %v1981_v14 }
  0x50   :  { %v377_v30 = vld [vmem:[%s2218_s5 + $0xf0] sm:$0xff]  ;;  %v378_v33 = vld [vmem:[%s2218_s5 + $0xf8] sm:$0xff]  ;;  %v379_v37 = vld [vmem:[#allocation2] sm:$0x3]  ;;  %v860_v42 = vcombine.low %v847_v22, %v848_v23  ;;  %v584_v51 = vcombine.high %v1990_v20, %v580_v34  ;;  %v598_v52 = vrot.slane %v582_v35, %v1949_v54  ;;  %v2029_v56 = vrot.slane %v858_v25, %v1949_v54 }
  0x51   :  { %1528 = vmatpush3.bf16.msra.mxu1 %v1958_v61  ;;  %1496 = vmatpush3.bf16.msra.mxu0 %v1958_v61  ;;  %v380_v43 = vld [vmem:[#allocation2 + $0x2] sm:$0x3]  ;;  %v381_v44 = vld [vmem:[#allocation2 + $0x4] sm:$0x3]  ;;  %v382_v45 = vld [vmem:[#allocation2 + $0x6] sm:$0x3]  ;;  %v2032_v57 = vrot.slane %v859_v36, %v1949_v54  ;;  %v2042_v3 = vpack.c.bf16 %v360_v29, %v359_v28  ;;  %v2044_v4 = vpack.c.bf16 %v378_v33, %v377_v30 }
  0x52   :  { %1530 = vmatprep.subr.bf16.mxu1 %v1968_v5  ;;  %v361_v47 = vld [vmem:[%s2218_s5 + $0x70] sm:$0xff]  ;;  %v362_v50 = vld [vmem:[%s2218_s5 + $0x78] sm:$0xff]  ;;  %1498 = vmatprep.subr.bf16.mxu0 %v1968_v5  ;;  %v383_v53 = vld [vmem:[#allocation2 + $0x8] sm:$0x3]  ;;  %v2035_v58 = vrot.slane %v860_v42, %v1949_v54  ;;  %v612_v0 = vrot.slane %v584_v51, %v1949_v54  ;;  %v395_v1 = vcombine.low %v379_v37, %v380_v43  ;;  %s1735_s5 = smov 64  }
  0x53   :  { %v384_v59 = vld [vmem:[#allocation2 + $0xa] sm:$0x3]  ;;  %v385_v60 = vld [vmem:[#allocation2 + $0xc] sm:$0x3]  ;;  %v386_v62 = vld [vmem:[#allocation2 + $0xe] sm:$0x3]  ;;  %v396_v2 = vcombine.low %v381_v44, %v382_v45  ;;  %v583_v7 = vcombine.low %v1990_v20, %v580_v34  ;;  %v2049_v10 = vpack.c.bf16 %v362_v50, %v361_v47  ;;  %v890_v17 = vcombine.high %v2026_v55, %v2029_v56 }
  0x54   :  { %v687_v8 = vld [vmem:[#allocation4] sm:$0x3]  ;;  %v688_v9 = vld [vmem:[#allocation4 + $0x2] sm:$0x3]  ;;  %v614_v11 = vcombine.low %v598_v52, %v612_v0  ;;  %v397_v12 = vcombine.low %v383_v53, %v384_v59  ;;  %v398_v15 = vcombine.low %v385_v60, %v386_v62  ;;  %v689_v16 = vld [vmem:[#allocation4 + $0x4] sm:$0x3]  ;;  %v892_v18 = vcombine.high %v2032_v57, %v2035_v58 }
  0x55   :  { %1532 = vmatpush3.bf16.msra.mxu1 %v1993_v26  ;;  %1500 = vmatpush3.bf16.msra.mxu0 %v1993_v26  ;;  %v405_v13 = vrot.slane %v395_v1, %v1949_v54  ;;  %v412_v14 = vrot.slane %v396_v2, %v1949_v54  ;;  %v690_v19 = vld [vmem:[#allocation4 + $0x6] sm:$0x3]  ;;  %v691_v20 = vld [vmem:[#allocation4 + $0x8] sm:$0x3]  ;;  %v692_v21 = vld [vmem:[#allocation4 + $0xa] sm:$0x3]  ;;  %v703_v28 = vcombine.low %v687_v8, %v688_v9 }
  0x56   :  { %1534 = vmatprep.subr.bf16.mxu1 %v2011_v39  ;;  %1502 = vmatprep.subr.bf16.mxu0 %v2011_v39  ;;  %v419_v22 = vrot.slane %v397_v12, %v1949_v54  ;;  %v426_v23 = vrot.slane %v398_v15, %v1949_v54  ;;  %v693_v24 = vld [vmem:[#allocation4 + $0xc] sm:$0x3]  ;;  %v694_v25 = vld [vmem:[#allocation4 + $0xe] sm:$0x3]  ;;  %v591_v29 = vrot.slane %v581_v6, %v1949_v54  ;;  %v995_v15 = vld [vmem:[#allocation8] sm:$0x3] }
  0x57   :  { %681 = vmatprep.mubr.f32.mxu1 %v614_v11  ;;  %v605_v30 = vrot.slane %v583_v7, %v1949_v54  ;;  %v428_v33 = vcombine.high %v405_v13, %v412_v14  ;;  %v427_v34 = vcombine.low %v405_v13, %v412_v14  ;;  %v704_v37 = vcombine.low %v689_v16, %v690_v19  ;;  %v996_v16 = vld [vmem:[#allocation8 + $0x2] sm:$0x3]  ;;  %v999_v13 = vld [vmem:[#allocation8 + $0x8] sm:$0x3]  ;;  %v1000_v14 = vld [vmem:[#allocation8 + $0xa] sm:$0x3] }
  0x58   :  { %v430_v35 = vcombine.high %v419_v22, %v426_v23  ;;  %v429_v36 = vcombine.low %v419_v22, %v426_v23  ;;  %v705_v42 = vcombine.low %v691_v20, %v692_v21  ;;  %v906_v43 = vrot.slane %v890_v17, %v1949_v54  ;;  %v997_v17 = vld [vmem:[#allocation8 + $0x4] sm:$0x3]  ;;  %v1001_v19 = vld [vmem:[#allocation8 + $0xc] sm:$0x3]  ;;  %v1002_v20 = vld [vmem:[#allocation8 + $0xe] sm:$0x3] }
  0x59   :  { %1536 = vmatpush3.bf16.msra.mxu1 %v2014_v46  ;;  %1504 = vmatpush3.bf16.msra.mxu0 %v2014_v46  ;;  %v444_v44 = vrot.slane %v428_v33, %v1949_v54  ;;  %v706_v45 = vcombine.low %v693_v24, %v694_v25  ;;  %v2070_v47 = vrot.slane %v703_v28, %v1949_v54 }
  0x5a   :  { %1538 = vmatprep.subr.bf16.mxu1 %v2038_v63  ;;  %1506 = vmatprep.subr.bf16.mxu0 %v2038_v63  ;;  %v920_v50 = vrot.slane %v892_v18, %v1949_v54  ;;  %v458_v51 = vrot.slane %v430_v35, %v1949_v54  ;;  %v2076_v52 = vrot.slane %v704_v37, %v1949_v54  ;;  %v998_v18 = vld [vmem:[#allocation8 + $0x6] sm:$0x3] }
  0x5b   :  { %v2079_v53 = vrot.slane %v705_v42, %v1949_v54  ;;  %v437_v59 = vrot.slane %v427_v34, %v1949_v54  ;;  %v451_v60 = vrot.slane %v429_v36, %v1949_v54  ;;  %v2085_v62 = vrot.slane %v706_v45, %v1949_v54 }
  0x5c   :  { %v460_v0 = vcombine.low %v444_v44, %v458_v51  ;;  %v736_v1 = vcombine.high %v2070_v47, %v2076_v52  ;;  %v613_v2 = vcombine.low %v591_v29, %v605_v30  ;;  %v922_v7 = vcombine.low %v906_v43, %v920_v50 }
  0x5d   :  { %1540 = vmatpush3.bf16.msra.mxu1 %v2042_v3  ;;  %1508 = vmatpush3.bf16.msra.mxu0 %v2042_v3  ;;  %v738_v6 = vcombine.high %v2079_v53, %v2085_v62  ;;  %v459_v9 = vcombine.low %v437_v59, %v451_v60  ;;  %v1011_v21 = vcombine.low %v995_v15, %v996_v16 }
  0x5e   :  { %1542 = vmatprep.subr.bf16.mxu1 %v2044_v4  ;;  %1510 = vmatprep.subr.bf16.mxu0 %v2044_v4  ;;  %v752_v8 = vrot.slane %v736_v1, %v1949_v54  ;;  %v1012_v22 = vcombine.low %v997_v17, %v998_v18  ;;  %v1013_v23 = vcombine.low %v999_v13, %v1000_v14 }
  0x5f   :  { %527 = vmatprep.mubr.f32.mxu0 %v460_v0  ;;  %v766_v11 = vrot.slane %v738_v6, %v1949_v54  ;;  %v1014_v24 = vcombine.low %v1001_v19, %v1002_v20  ;;  %v1021_v25 = vrot.slane %v1011_v21, %v1949_v54  ;;  %v889_v33 = vcombine.low %v2026_v55, %v2029_v56 }
  0x60   :  { %v1028_v28 = vrot.slane %v1012_v22, %v1949_v54  ;;  %v1035_v29 = vrot.slane %v1013_v23, %v1949_v54  ;;  %v891_v34 = vcombine.low %v2032_v57, %v2035_v58  ;;  %v735_v35 = vcombine.low %v2070_v47, %v2076_v52 }
  0x61   :  { %1544 = vmatpush3.bf16.msra.mxu1 %v2049_v10  ;;  %1512 = vmatpush3.bf16.msra.mxu0 %v2049_v10  ;;  %v768_v12 = vcombine.low %v752_v8, %v766_v11  ;;  %v1042_v30 = vrot.slane %v1014_v24, %v1949_v54  ;;  %v737_v36 = vcombine.low %v2079_v53, %v2085_v62 }
  0x62   :  { %1578 = vmatprep.subr.bf16.mxu1 %v1879_v27  ;;  %1546 = vmatprep.subr.bf16.mxu0 %v1879_v27  ;;  %v1044_v37 = vcombine.high %v1021_v25, %v1028_v28  ;;  %v899_v55 = vrot.slane %v889_v33, %v1949_v54  ;;  %v913_v56 = vrot.slane %v891_v34, %v1949_v54 }
  0x63   :  { %v1046_v42 = vcombine.high %v1035_v29, %v1042_v30  ;;  %v745_v57 = vrot.slane %v735_v35, %v1949_v54  ;;  %v759_v58 = vrot.slane %v737_v36, %v1949_v54 }
  0x64   :  { %682 = vmatmul.mubr.f32.vlgmr.msra.gmra.mrb[0].mxu1 %v613_v2  ;;  %528 = vmatmul.mubr.f32.vlgmr.msra.gmra.mrb[0].mxu0 %v459_v9  ;;  %v1060_v43 = vrot.slane %v1044_v37, %v1949_v54  ;;  %v921_v45 = vcombine.low %v899_v55, %v913_v56 }
  0x65   :  { %1580 = vmatpush3.bf16.msra.mxu1 %v1890_v31  ;;  %989 = vmatprep.mubr.f32.mxu1 %v922_v7  ;;  %v1074_v44 = vrot.slane %v1046_v42, %v1949_v54  ;;  %v767_v47 = vcombine.low %v745_v57, %v759_v58 }
  0x66   :  { %1582 = vmatprep.subr.bf16.mxu1 %v1892_v32  ;;  %1548 = vmatpush3.bf16.msra.mxu0 %v1890_v31 }
  0x67   :  { %835 = vmatprep.mubr.f32.mxu0 %v768_v12  ;;  %1550 = vmatprep.subr.bf16.mxu0 %v1892_v32  ;;  %v1076_v50 = vcombine.low %v1060_v43, %v1074_v44 }
  0x69   :  { %1584 = vmatpush3.bf16.msra.mxu1 %v1909_v40 }
  0x6a   :  { %1586 = vmatprep.subr.bf16.mxu1 %v1913_v41  ;;  %1552 = vmatpush3.bf16.msra.mxu0 %v1909_v40 }
  0x6b   :  { %1554 = vmatprep.subr.bf16.mxu0 %v1913_v41 }
  0x6d   :  { %1588 = vmatpush3.bf16.msra.mxu1 %v1930_v48 }
  0x6e   :  { %1590 = vmatprep.subr.bf16.mxu1 %v1934_v49  ;;  %1556 = vmatpush3.bf16.msra.mxu0 %v1930_v48 }
  0x6f   :  { %1558 = vmatprep.subr.bf16.mxu0 %v1934_v49 }
  0x71   :  { %1592 = vmatpush3.bf16.msra.mxu1 %v1958_v61 }
  0x72   :  { %1594 = vmatprep.subr.bf16.mxu1 %v1968_v5  ;;  %1560 = vmatpush3.bf16.msra.mxu0 %v1958_v61 }
  0x73   :  { %1562 = vmatprep.subr.bf16.mxu0 %v1968_v5 }
  0x75   :  { %1596 = vmatpush3.bf16.msra.mxu1 %v1993_v26 }
  0x76   :  { %1598 = vmatprep.subr.bf16.mxu1 %v2011_v39  ;;  %1564 = vmatpush3.bf16.msra.mxu0 %v1993_v26 }
  0x77   :  { %1566 = vmatprep.subr.bf16.mxu0 %v2011_v39 }
  0x79   :  { %1600 = vmatpush3.bf16.msra.mxu1 %v2014_v46 }
  0x7a   :  { %1602 = vmatprep.subr.bf16.mxu1 %v2038_v63  ;;  %1568 = vmatpush3.bf16.msra.mxu0 %v2014_v46 }
  0x7b   :  { %1570 = vmatprep.subr.bf16.mxu0 %v2038_v63 }
  0x7d   :  { %1604 = vmatpush3.bf16.msra.mxu1 %v2042_v3 }
  0x7e   :  { %1606 = vmatprep.subr.bf16.mxu1 %v2044_v4  ;;  %1572 = vmatpush3.bf16.msra.mxu0 %v2042_v3 }
  0x7f   :  { %1574 = vmatprep.subr.bf16.mxu0 %v2044_v4 }
  0x81   :  { %1608 = vmatpush3.bf16.msra.mxu1 %v2049_v10 }
  0x82   :  { %1576 = vmatpush3.bf16.msra.mxu0 %v2049_v10 }
  0x83   :  { %1610 = vmatprep.subr.bf16.mxu0 %v1879_v27  ;;  %v1043_v27 = vcombine.low %v1021_v25, %v1028_v28 }
  0x84   :  { %990 = vmatmul.mubr.f32.vlgmr.msra.gmra.mrb[2].mxu1 %v921_v45 }
  0x85   :  { %836 = vmatmul.mubr.f32.vlgmr.msra.gmra.mrb[2].mxu0 %v767_v47 }
  0x86   :  { %1612 = vmatpush3.bf16.msra.mxu0 %v1890_v31  ;;  %1143 = vmatprep.mubr.f32.mxu0 %v1076_v50  ;;  %v1045_v31 = vcombine.low %v1035_v29, %v1042_v30 }
  0x87   :  { %1614 = vmatprep.subr.bf16.mxu0 %v1892_v32  ;;  %v1053_v32 = vrot.slane %v1043_v27, %v1949_v54 }
  0x8a   :  { %1616 = vmatpush3.bf16.msra.mxu0 %v1909_v40  ;;  %v1067_v40 = vrot.slane %v1045_v31, %v1949_v54 }
  0x8b   :  { %1618 = vmatprep.subr.bf16.mxu0 %v1913_v41 }
  0x8c   :  { %v1075_v41 = vcombine.low %v1053_v32, %v1067_v40 }
  0x8e   :  { %1620 = vmatpush3.bf16.msra.mxu0 %v1930_v48 }
  0x8f   :  { %1622 = vmatprep.subr.bf16.mxu0 %v1934_v49 }
  0x92   :  { %1624 = vmatpush3.bf16.msra.mxu0 %v1958_v61 }
  0x93   :  { %1626 = vmatprep.subr.bf16.mxu0 %v1968_v5 }
  0x96   :  { %1628 = vmatpush3.bf16.msra.mxu0 %v1993_v26 }
  0x97   :  { %1630 = vmatprep.subr.bf16.mxu0 %v2011_v39 }
  0x9a   :  { %1632 = vmatpush3.bf16.msra.mxu0 %v2014_v46 }
  0x9b   :  { %1634 = vmatprep.subr.bf16.mxu0 %v2038_v63 }
  0x9e   :  { %1636 = vmatpush3.bf16.msra.mxu0 %v2042_v3 }
  0x9f   :  { %1638 = vmatprep.subr.bf16.mxu0 %v2044_v4 }
  0xa2   :  { %1640 = vmatpush3.bf16.msra.mxu0 %v2049_v10 }
  0xa5   :  { %1144 = vmatmul.mubr.f32.vlgmr.msra.gmra.mrb[4].mxu0 %v1075_v41 }
 0x137   :  { %v1373_v48 = vpop.f32.mrb[0].mxu1  ;;  %v1338_v5 = vpop.f32.mrb[0].mxu0 }
 0x138   :  { %v1374_v49 = vpop.f32.mrb[1].mxu1  ;;  %v1339_v26 = vpop.f32.mrb[1].mxu0 }
 0x139   :  { %v1375_v61 = vadd.f32 %v1374_v49, %v1373_v48  ;;  %v1340_v39 = vadd.f32 %v1339_v26, %v1338_v5 }
 0x13b   :  { %1150 = vrot.lane.b32.xlu0 %v1375_v61, %s1735_s5 }
 0x157   :  { %v1443_v46 = vpop.f32.mrb[2].mxu1 }
 0x158   :  { %v1444_v63 = vpop.f32.mrb[3].mxu1  ;;  %v1408_v52 = vpop.f32.mrb[2].mxu0 }
 0x159   :  { %v1445_v51 = vadd.f32 %v1444_v63, %v1443_v46  ;;  %v1409_v53 = vpop.f32.mrb[3].mxu0 }
 0x15a   :  { %v1410_v3 = vadd.f32 %v1409_v53, %v1408_v52 }
 0x15b   :  { %1154 = vrot.lane.b32.xlu0 %v1445_v51, %s1735_s5 }
 0x178   :  { %v1478_v4 = vpop.f32.mrb[4].mxu0 }
 0x179   :  { %v1479_v59 = vpop.f32.mrb[5].mxu0 }
 0x17a   :  { %v1480_v60 = vadd.f32 %v1479_v59, %v1478_v4 }
 0x17c   :  { %v1165_v62 = vcombine.high %v1480_v60, %v1480_v60  ;;  %v1186_v9 = vrot.slane %v1480_v60, %v1949_v54 }
 0x17e   :  { %v1193_v6 = vrot.slane %v1165_v62, %v1949_v54 }
 0x1ad   :  { %v1151_v10 = vpop.permute.xlu0 %1150 }
 0x1ae   :  { %v1158_v1 = vsel %vm1157_vm0, %v1340_v39, %v1151_v10 }
 0x1cd   :  { %v1155_v0 = vpop.permute.xlu0 %1154 }
 0x1ce   :  { %v1159_v2 = vsel %vm1157_vm0, %v1410_v3, %v1155_v0 }
 0x1cf   :  { %v1163_v7 = vcombine.low %v1158_v1, %v1159_v2  ;;  %v1164_v8 = vcombine.high %v1158_v1, %v1159_v2 }
 0x1d1   :  { %v1172_v11 = vrot.slane %v1163_v7, %v1949_v54  ;;  %v1179_v12 = vrot.slane %v1164_v8, %v1949_v54 }
 0x1d3   :  { %v1194_v15 = vcombine.low %v1172_v11, %v1186_v9  ;;  %v1195_v16 = vcombine.high %v1172_v11, %v1186_v9  ;;  %v1196_v17 = vcombine.low %v1179_v12, %v1193_v6  ;;  %v1197_v18 = vcombine.high %v1179_v12, %v1193_v6 }
 0x1d5   :  { %v1204_v14 = vrot.slane %v1194_v15, %v1949_v54  ;;  %v1211_v19 = vrot.slane %v1196_v17, %v1949_v54  ;;  %v1218_v20 = vrot.slane %v1195_v16, %v1949_v54  ;;  %v1225_v21 = vrot.slane %v1197_v18, %v1949_v54 }
 0x1d7   :  { %v1226_v22 = vcombine.high %v1204_v14, %v1204_v14  ;;  %v1227_v23 = vcombine.high %v1211_v19, %v1211_v19  ;;  %v1228_v24 = vcombine.high %v1218_v20, %v1218_v20  ;;  %v1229_v38 = vcombine.high %v1225_v21, %v1225_v21  ;;  %1242 = vst.msk [vmem:[#allocation10] sm:$0x7] %vm2170_vm1, %v1204_v14 }
 0x1d8   :  { %1243 = vst.msk [vmem:[#allocation10 + $0x3] sm:$0x7] %vm2170_vm1, %v1218_v20  ;;  %1246 = vst.msk [vmem:[#allocation10 + $0xc] sm:$0x7] %vm2170_vm1, %v1211_v19 }
 0x1d9   :  { %1247 = vst.msk [vmem:[#allocation10 + $0xf] sm:$0x7] %vm2170_vm1, %v1225_v21  ;;  %1244 = vst.msk [vmem:[#allocation10 + $0x6] sm:$0x7] %vm2170_vm1, %v1226_v22 }
 0x1da   :  { %1245 = vst.msk [vmem:[#allocation10 + $0x9] sm:$0x7] %vm2170_vm1, %v1228_v24  ;;  %1248 = vst.msk [vmem:[#allocation10 + $0x12] sm:$0x7] %vm2170_vm1, %v1227_v23 }
 0x1db   :  { %1249 = vst.msk [vmem:[#allocation10 + $0x15] sm:$0x7] %vm2170_vm1, %v1229_v38 }
 0x1dc   :  { %1712 = shalt.err (!%p1709_p0)
}
 0x1dd   :  { %s1713_s2 = scalar_lea.hbm %s2219_s6, 384 }
 0x1de   :  { %p1714_p1 = scmp.ne.s32.totalorder %s2219_s6, %s1713_s2  ;;  %p1717_p2 = scmp.lt.u32.totalorder %s1713_s2, %s2219_s6 }
 0x1e0   :  { %p1719_p3 = pnand %p1717_p2, %p1714_p1 }
 0x1e2   :  { %1722 = shalt.err (!%p1719_p3)
}
 0x1e3   :  { %s1737_s11 = smov 48   ;;  %s1738_s3 = smov 3  }
 0x1e4   :  { %1261 = dma.vmem_to_hbm [thread:$0]  %s2178_s27, 384, %s2219_s6, [#allocation7], %s1737_s11, %s1737_s11, %s1738_s3  }
 0x1e5   :  { %1727 = dma.done.wait [#allocation7], 384  }
 0x1e6   :  { %1728 = vsyncadd [#allocation7], 4294966912 }
 0x1e7   :  { %1265 = vsyncpa [#allocation6], 1 }
 0x1e8   :  { %1266 = vsyncpa [#allocation9], 1 }
 0x1e9   :  { %1267 = vsyncpa [#allocation7], 1 }

</bundles_post_ra>
